<compile_context>
chip_gen: v6e
topology: v6e:2x2x1
jax: 0.10.0
libtpu: 0.0.40
codegen_flags: <defaults>
</compile_context>

<pallas_src>
import jax
import jax.numpy as jnp
from jax.experimental import pallas as pl
from jax.experimental.pallas import tpu as pltpu


# ---------------------------------------------------------------------------
# Hardware / block-size selection
# ---------------------------------------------------------------------------
def _vmem_capacity_bytes():
    """Per-core VMEM capacity; conservative (v7x) fallback if unqueryable."""
    try:
        info = pltpu.get_tpu_info()
        cap = int(getattr(info, "vmem_capacity_bytes", 0))
        if cap > 0:
            return cap
    except Exception:
        pass
    return 64 * 1024 * 1024


def _largest_aligned_divisor(total, cap, quantum):
    """Largest multiple of `quantum` that divides `total` and is <= cap.

    Falls back to `total` (the full, always-legal dimension) if no such
    divisor exists; the wrapper sizes vmem_limit_bytes from the *actual*
    chosen block so the fallback cannot silently blow the compiler limit.
    """
    if total <= cap:
        return total
    c = (min(cap, total) // quantum) * quantum
    while c >= quantum:
        if total % c == 0:
            return c
        c -= quantum
    return total


def _choose_blocks(B, N, F, itemsize, budget_bytes, tn_quantum):
    row_bytes = max(1, N * F * itemsize)
    if B <= 8:
        bb = B
    else:
        # As many batch rows per step as the budget allows (multiple of 8),
        # but keep >= 2 batch blocks so v7x megacore can shard the
        # "parallel" axis across both TensorCores.
        cap_rows = max(8, budget_bytes // row_bytes)
        cap_rows = min(cap_rows, max(8, B // 2))
        bb = _largest_aligned_divisor(B, cap_rows, 8)
    # Node tile: full N if the (bb, N, F) seq block fits the budget, else the
    # largest aligned divisor that does.  tn sits on the sublane axis of the
    # seq block (quantum 8); the masked path additionally needs tn lane-dense
    # for the (bb, tn) mask block (quantum 128).
    cap_elems = max(1, budget_bytes // (bb * F * itemsize))
    tn = N if N <= cap_elems else _largest_aligned_divisor(N, cap_elems, tn_quantum)
    return bb, tn


# ---------------------------------------------------------------------------
# Kernels
# ---------------------------------------------------------------------------
def _make_mean_kernel(inv_n):
    inv_n = float(inv_n)  # Python literal -> folded constant, not a captured jnp array.

    def kernel(seq_ref, out_ref, acc_ref):
        # seq_ref: (bb, tn, F); out_ref: (bb, F); acc_ref: (bb, F) f32 scratch.
        k = pl.program_id(1)

        @pl.when(k == 0)
        def _init():
            acc_ref[...] = jnp.zeros_like(acc_ref)

        # Node-axis partial sum, accumulated in f32 (single full-block update).
        acc_ref[...] += jnp.sum(seq_ref[...], axis=1, dtype=jnp.float32)

        @pl.when(k == pl.num_programs(1) - 1)
        def _finalize():
            out_ref[...] = (acc_ref[...] * inv_n).astype(out_ref.dtype)

    return kernel


def _masked_kernel(scale_ref, seq_ref, msk_ref, out_ref, acc_ref):
    # scale_ref: (1, 1) f32 in SMEM, = 1 / (N * sum(msk))  (global, precomputed)
    # seq_ref:   (bb, tn, F)   native dtype (f32 or bf16)
    # msk_ref:   (bb, tn)      lane-dense mask block, same dtype as seq
    # out_ref:   (bb, F)
    # acc_ref:   (bb, F) f32 scratch
    k = pl.program_id(1)

    @pl.when(k == 0)
    def _init():
        acc_ref[...] = jnp.zeros_like(acc_ref)

    # Masked node-sum in the native dtype (no f32 upcast of the streamed
    # tensor); lane-broadcast multiply + sublane reduce, one (bb, F) f32
    # accumulator update per step.
    prod = seq_ref[...] * msk_ref[...][:, :, None]
    acc_ref[...] += jnp.sum(prod, axis=1, dtype=jnp.float32)

    @pl.when(k == pl.num_programs(1) - 1)
    def _finalize():
        out_ref[...] = (acc_ref[...] * scale_ref[0, 0]).astype(out_ref.dtype)


# ---------------------------------------------------------------------------
# Wrapper
# ---------------------------------------------------------------------------
def readout(seq, msk=None, *, block_budget_bytes=None):
    """Pallas implementation of Readout.forward.

    seq: (B, N, F) float32 or bfloat16
    msk: optional (B, N)
    returns: (B, F) with seq's dtype
    """
    seq = jnp.asarray(seq)
    if seq.dtype not in (jnp.float32, jnp.bfloat16):
        seq = seq.astype(jnp.float32)
    B, N, F = seq.shape
    itemsize = jnp.dtype(seq.dtype).itemsize

    vmem_cap = _vmem_capacity_bytes()
    if block_budget_bytes is None:
        block_budget_bytes = min(16 * 1024 * 1024, vmem_cap // 4)

    tn_quantum = 8 if msk is None else 128
    bb, tn = _choose_blocks(B, N, F, itemsize, block_budget_bytes, tn_quantum)
    assert B % bb == 0 and N % tn == 0
    grid = (B // bb, N // tn)

    out_shape = jax.ShapeDtypeStruct((B, F), seq.dtype)
    seq_spec = pl.BlockSpec((bb, tn, F), lambda i, k: (i, k, 0))
    out_spec = pl.BlockSpec((bb, F), lambda i, k: (i, 0))
    scratch = [pltpu.VMEM((bb, F), jnp.float32)]

    # VMEM limit derived from the actual (double-buffered) block footprint,
    # clamped to this generation's physical VMEM.
    seq_block_bytes = bb * tn * F * itemsize
    msk_block_bytes = 0 if msk is None else bb * max(tn, 128) * itemsize
    vmem_need = (2 * seq_block_bytes + 2 * msk_block_bytes
                 + bb * F * 4 + bb * F * itemsize + (2 << 20))
    vmem_limit = int(min(vmem_cap, max(vmem_need, 32 * 1024 * 1024)))

    compiler_params = pltpu.CompilerParams(
        dimension_semantics=("parallel", "arbitrary"),
        vmem_limit_bytes=vmem_limit,
    )

    bytes_accessed = B * N * F * itemsize + B * F * itemsize
    flops = B * N * F
    if msk is not None:
        bytes_accessed += B * N * itemsize
        flops *= 2
    cost = pl.CostEstimate(flops=flops, transcendentals=0,
                           bytes_accessed=bytes_accessed)

    if msk is None:
        return pl.pallas_call(
            _make_mean_kernel(1.0 / N),
            out_shape=out_shape,
            grid_spec=pltpu.PrefetchScalarGridSpec(
                num_scalar_prefetch=0,
                grid=grid,
                in_specs=[seq_spec],
                out_specs=out_spec,
                scratch_shapes=scratch,
            ),
            compiler_params=compiler_params,
            cost_estimate=cost,
        )(seq)

    # Global normalizer precomputed once in f32 (matches the PyTorch module's
    # global torch.sum(msk)); the mask block itself is streamed in seq's
    # dtype so bf16 inputs keep half-byte DMA traffic.
    msk_f32 = jnp.asarray(msk, jnp.float32)
    scale = (1.0 / (jnp.float32(N) * jnp.sum(msk_f32))).reshape(1, 1)
    msk_blk = msk_f32.astype(seq.dtype)

    return pl.pallas_call(
        _masked_kernel,
        out_shape=out_shape,
        grid_spec=pltpu.PrefetchScalarGridSpec(
            num_scalar_prefetch=0,
            grid=grid,
            in_specs=[
                pl.BlockSpec(memory_space=pltpu.MemorySpace.SMEM),   # scale (1,1)
                seq_spec,                                            # seq  (bb,tn,F)
                pl.BlockSpec((bb, tn), lambda i, k: (i, k)),         # msk  (bb,tn)
            ],
            out_specs=out_spec,
            scratch_shapes=scratch,
        ),
        compiler_params=compiler_params,
        cost_estimate=cost,
    )(scale, seq, msk_blk)


# ---------------------------------------------------------------------------
# Main
# ---------------------------------------------------------------------------
def _check(B, N, F, key, budget=None):
    kw = {} if budget is None else {"block_budget_bytes": budget}
    k_seq, k_msk = jax.random.split(key)
    seq = jax.random.normal(k_seq, (B, N, F), dtype=jnp.float32)
    msk = (jax.random.uniform(k_msk, (B, N)) > 0.3).astype(jnp.float32)

    out_nomask = jax.block_until_ready(readout(seq, None, **kw))
    out_masked = jax.block_until_ready(readout(seq, msk, **kw))

    ref_nomask = jnp.mean(seq, axis=1)
    ref_masked = jnp.mean(seq * msk[..., None], axis=1) / jnp.sum(msk)

    assert out_nomask.shape == (B, F) and out_masked.shape == (B, F)
    assert jnp.allclose(out_nomask, ref_nomask, atol=1e-4, rtol=1e-4)
    assert jnp.allclose(out_masked, ref_masked, atol=1e-4, rtol=1e-4)


if __name__ == "__main__":
    key = jax.random.PRNGKey(0)
    k1, k2, k3 = jax.random.split(key, 3)

    # Primary small case (matches the module's expected usage).
    _check(B=2, N=8, F=32, key=k1)
    # Multi-block batch axis (bb=8, grid=(2,1)) exercising megacore-friendly tiling.
    _check(B=16, N=256, F=128, key=k2)
    # Forced node tiling (tn=128 < N, grid k-axis of 2) to exercise the
    # accumulator init/finalize path.
    _check(B=2, N=256, F=128, key=k3, budget=128 * 1024)

    print("KERNEL_OK")
</pallas_src>

<mosaic_0001>
module attributes {stable_mosaic.version = 11 : i64} {
  func.func @kernel(%arg0: i32, %arg1: i32, %arg2: memref<2x8x32xf32, #tpu.memory_space<vmem>>, %arg3: memref<2x32xf32, #tpu.memory_space<vmem>>, %arg4: memref<2x32xf32, #tpu.memory_space<vmem>>) attributes {dimension_semantics = [#tpu.dimension_semantics<parallel>, #tpu.dimension_semantics<arbitrary>], iteration_bounds = array<i64: 1, 1>, scalar_prefetch = 0 : i64, scratch_operands = 1 : i64, tpu.core_type = #tpu.core_type<tc>, window_params = [{transform_indices = @transform_0, window_bounds = array<i64: 2, 8, 32>}, {transform_indices = @transform_1, window_bounds = array<i64: 2, 32>}]} {
    %c0_i32 = arith.constant 0 : i32
    %0 = arith.cmpi eq, %arg1, %c0_i32 : i32
    %1 = arith.extui %0 : i1 to i32
    %c0_i32_0 = arith.constant 0 : i32
    %2 = arith.cmpi ne, %1, %c0_i32_0 : i32
    scf.if %2 {
      %cst_9 = arith.constant 0.000000e+00 : f32
      %11 = vector.broadcast %cst_9 : f32 to vector<2x32xf32>
      %c0_10 = arith.constant 0 : index
      %c0_11 = arith.constant 0 : index
      %12 = vector.load %arg4[%c0_10, %c0_11] : memref<2x32xf32, #tpu.memory_space<vmem>>, vector<2x32xf32>
      tpu.vector_store %arg4[%c0_10, %c0_11], %11 {strides = array<i32>} : memref<2x32xf32, #tpu.memory_space<vmem>>, vector<2x32xf32>,
    } else {
    }
    %c0 = arith.constant 0 : index
    %c0_1 = arith.constant 0 : index
    %3 = vector.load %arg4[%c0, %c0_1] : memref<2x32xf32, #tpu.memory_space<vmem>>, vector<2x32xf32>
    %c0_2 = arith.constant 0 : index
    %c0_3 = arith.constant 0 : index
    %c0_4 = arith.constant 0 : index
    %4 = vector.load %arg2[%c0_2, %c0_3, %c0_4] : memref<2x8x32xf32, #tpu.memory_space<vmem>>, vector<2x8x32xf32>
    %cst = arith.constant dense<0.000000e+00> : vector<2x32xf32>
    %5 = vector.multi_reduction <add>, %4, %cst [1] : vector<2x8x32xf32> to vector<2x32xf32>
    %6 = arith.addf %3, %5 : vector<2x32xf32>
    %c0_5 = arith.constant 0 : index
    %c0_6 = arith.constant 0 : index
    %7 = vector.load %arg4[%c0_5, %c0_6] : memref<2x32xf32, #tpu.memory_space<vmem>>, vector<2x32xf32>
    tpu.vector_store %arg4[%c0_5, %c0_6], %6 {strides = array<i32>} : memref<2x32xf32, #tpu.memory_space<vmem>>, vector<2x32xf32>,
    %c0_i32_7 = arith.constant 0 : i32
    %8 = arith.cmpi eq, %arg1, %c0_i32_7 : i32
    %9 = arith.extui %8 : i1 to i32
    %c0_i32_8 = arith.constant 0 : i32
    %10 = arith.cmpi ne, %9, %c0_i32_8 : i32
    scf.if %10 {
      %c0_9 = arith.constant 0 : index
      %c0_10 = arith.constant 0 : index
      %11 = vector.load %arg4[%c0_9, %c0_10] : memref<2x32xf32, #tpu.memory_space<vmem>>, vector<2x32xf32>
      %cst_11 = arith.constant 1.250000e-01 : f32
      %12 = vector.broadcast %cst_11 : f32 to vector<2x32xf32>
      %13 = arith.mulf %11, %12 : vector<2x32xf32>
      %c0_12 = arith.constant 0 : index
      %c0_13 = arith.constant 0 : index
      %14 = vector.load %arg3[%c0_12, %c0_13] : memref<2x32xf32, #tpu.memory_space<vmem>>, vector<2x32xf32>
      tpu.vector_store %arg3[%c0_12, %c0_13], %13 {strides = array<i32>} : memref<2x32xf32, #tpu.memory_space<vmem>>, vector<2x32xf32>,
    } else {
    }
    return
  }
  func.func @transform_0(%arg0: i32, %arg1: i32) -> (i32, i32, i32) {
    %c0_i32 = arith.constant 0 : i32
    %c0_i32_0 = arith.constant 0 : i32
    return %arg0, %arg1, %c0_i32 : i32, i32, i32
  }
  func.func @transform_1(%arg0: i32, %arg1: i32) -> (i32, i32) {
    %c0_i32 = arith.constant 0 : i32
    %c0_i32_0 = arith.constant 0 : i32
    return %arg0, %c0_i32 : i32, i32
  }
}

</mosaic_0001>

<bundles_post_ra>
// kernel: tpu_custom_call.1
= control target key start
LH: loop header
LB: loop body
LE: loop exit
PB: predicated region body
PF: predicated region fallthrough
CT: control target
= control target key end

     0   :  { %6 = vsyncpa [#allocation4], 0  ;;  %s149_s0 = inlined_call_operand.hbm [shape: f32[2,8,32], index: 0, kind: input, shape index: {}]   ;;  %s150_s1 = inlined_call_operand.hbm [shape: f32[2,32], index: 1, kind: output, shape index: {}]  }
   0x1   :  { %7 = vsyncpa [#allocation5], 0  ;;  %s125_s6 = smov [#allocation3]  }
   0x2   :  { %s13_s7 = sshll.u32 %s125_s6, 4  ;;  %s14_s7 = int_to_ptr.vmem [resolvable:$true] %s13_s7 }
   0x3   :  { %s89_s8 = scalar_lea.vmem %s14_s7, 256  ;;  %p94_p1 = scmp.lt.s32.totalorder %s14_s7, %s14_s7 }
   0x4   :  { %p90_p0 = scmp.ne.s32.totalorder %s14_s7, %s89_s8  ;;  %p95_p2 = scmp.lt.s32.totalorder %s89_s8, %s89_s8 }
   0x6   :  { %p96_p3 = por %p95_p2, %p94_p1 }
   0x8   :  { %p97_p4 = pnand %p96_p3, %p90_p0 }
   0xa   :  { %100 = shalt.err (!%p97_p4)
}
   0xb   :  { %s126_s9 = smov 128   ;;  %s127_s10 = smov 8  }
   0xc   :  { %19 = dma.hbm_to_vmem [thread:$0]  %s149_s0, 256, %s14_s7, [#allocation4], %s126_s9, %s126_s9, %s127_s10  }
   0xd   :  { %121 = dma.done.wait [#allocation4], 256  }
   0xe   :  { %122 = vsyncadd [#allocation4], 4294967040  ;;  %vm27_vm0 = vcmask 254976   ;;  %v128_v0 = vmov 0.0   ;;  %vm32_vm1 = vcmask 261120   ;;  %v30_v1 = vld [vmem:[#allocation3] sm:$0xff] }
   0xf   :  { %28 = vst.msk [vmem:[#allocation2] sm:$0x3] %vm27_vm0, %v128_v0  ;;  %v31_v2 = vld [vmem:[#allocation3 + $0x8] sm:$0xff]  ;;  %v33_v3 = vsel %vm32_vm1, %v30_v1, 0.0  ;;  %vm49_vm2 = vcmask 1041409   ;;  %s129_s0 = smov [#allocation6]  }
  0x10   :  { %v40_v4 = vsel %vm32_vm1, %v31_v2, 0.0  ;;  %v34_v5 = vrot.slane %v33_v3, 4  ;;  %s67_s13 = sshll.u32 %s129_s0, 4  ;;  %s68_s13 = int_to_ptr.vmem [resolvable:$true] %s67_s13 }
  0x11   :  { %v41_v6 = vrot.slane %v40_v4, 4  ;;  %s101_s14 = scalar_lea.vmem %s68_s13, 32  ;;  %p106_p6 = scmp.lt.s32.totalorder %s68_s13, %s68_s13 }
  0x12   :  { %v35_v7 = vadd.f32 %v34_v5, %v33_v3  ;;  %p102_p5 = scmp.ne.s32.totalorder %s68_s13, %s101_s14  ;;  %p107_p7 = scmp.lt.s32.totalorder %s101_s14, %s101_s14 }
  0x13   :  { %v42_v8 = vadd.f32 %v41_v6, %v40_v4 }
  0x14   :  { %v36_v9 = vrot.slane %v35_v7, 2  ;;  %p108_p8 = por %p107_p7, %p106_p6 }
  0x15   :  { %v43_v10 = vrot.slane %v42_v8, 2 }
  0x16   :  { %v37_v11 = vadd.f32 %v36_v9, %v35_v7  ;;  %v29_v15 = vld [vmem:[#allocation2] sm:$0x3]  ;;  %p109_p9 = pnand %p108_p8, %p102_p5 }
  0x17   :  { %v44_v12 = vadd.f32 %v43_v10, %v42_v8 }
  0x18   :  { %v38_v13 = vrot.slane %v37_v11, 1 }
  0x19   :  { %v45_v14 = vrot.slane %v44_v12, 1 }
  0x1a   :  { %v39_v16 = vadd.f32 %v38_v13, %v37_v11 }
  0x1b   :  { %v46_v17 = vadd.f32 %v45_v14, %v44_v12 }
  0x1d   :  { %v50_v18 = vsel %vm49_vm2, %v46_v17, %v39_v16 }
  0x1e   :  { %v52_v19 = vadd.f32 %v50_v18, %v29_v15 }
  0x20   :  { %54 = vst.msk [vmem:[#allocation2] sm:$0x3] %vm27_vm0, %v52_v19 }
  0x27   :  { %v58_v20 = vld [vmem:[#allocation2] sm:$0x3] }
  0x28   :  { %v59_v21 = vmul.f32 0.125, %v58_v20 }
  0x2a   :  { %60 = vst.msk [vmem:[#allocation6] sm:$0x3] %vm27_vm0, %v59_v21 }
  0x2b   :  { %112 = shalt.err (!%p109_p9)
}
  0x2c   :  { %70 = dma.vmem_to_hbm [thread:$0]  %s68_s13, 32, %s150_s1, [#allocation5]  }
  0x2d   :  { %123 = dma.done.wait [#allocation5], 32  }
  0x2e   :  { %124 = vsyncadd [#allocation5], 4294967264 }
  0x2f   :  { %74 = vsyncpa [#allocation4], 1 }
  0x30   :  { %75 = vsyncpa [#allocation5], 1 }

</bundles_post_ra>
